<compile_context>
chip_gen: v5e
topology: v5e:2x2
jax: 0.10.0
libtpu: 0.0.40
codegen_flags: <defaults>
</compile_context>

<pallas_src>
import functools

import jax
import jax.numpy as jnp
from jax.experimental import pallas as pl
from jax.experimental.pallas import tpu as pltpu


# ----------------------------------------------------------------------------
# Fused kernel: (A @ HW) accumulation over K tiles, then router (top-k softmax),
# gated combine of per-expert pre-folded classifier logits, packed store.
# ----------------------------------------------------------------------------
def _fused_gmoe_kernel(adj_ref, hw_ref, wgate_ref, bcls_ref, out_ref, acc_ref,
                       *, moe_hidden, num_experts, num_classes, top_k):
    f32 = jnp.float32
    k = pl.program_id(1)

    @pl.when(k == 0)
    def _init():
        acc_ref[...] = jnp.zeros_like(acc_ref)

    # Dominant MXU matmul: adjacency row-tile x fused (features @ weights) slab.
    acc_ref[...] += jnp.dot(adj_ref[...], hw_ref[...],
                            preferred_element_type=f32)          # [tm, F_pad] f32

    @pl.when(k == pl.num_programs(1) - 1)
    def _epilogue():
        agg = acc_ref[...]                                       # [tm, F_pad] f32
        cd = wgate_ref.dtype                                     # MXU compute dtype

        # gmoe.moe_layer (synthetic GCN): h_moe = relu((A h) W_moe)
        h_moe = jnp.maximum(agg[:, :moe_hidden], 0.0)            # [tm, Hm]

        # purified_router: NoisyTopKGate, eval mode (no noise).
        gate_logits = jnp.dot(h_moe.astype(cd), wgate_ref[...],
                              preferred_element_type=f32)        # [tm, E] f32

        # Dense top-k (E is tiny): iteratively pick the max, ties -> lowest index.
        lane = jax.lax.broadcasted_iota(jnp.int32, gate_logits.shape, 1)
        masked = gate_logits
        selected = jnp.zeros(gate_logits.shape, dtype=jnp.bool_)
        idx_cols = []
        for _ in range(top_k):
            cur_max = jnp.max(masked, axis=-1, keepdims=True)
            is_max = masked == cur_max
            idx = jnp.min(jnp.where(is_max, lane, num_experts),
                          axis=-1, keepdims=True)
            onehot = lane == idx
            selected = jnp.logical_or(selected, onehot)
            masked = jnp.where(onehot, -1e30, masked)
            idx_cols.append(idx)
        topk_f = jnp.concatenate(idx_cols, axis=-1).astype(f32)  # [tm, k] (small ints)

        # Softmax over the selected (top-k) logits, zeros elsewhere.  Keep f32
        # (the -1e30 sentinel + exp underflow is only well behaved in f32).
        sel_logits = jnp.where(selected, gate_logits, -1e30)
        m = jnp.max(sel_logits, axis=-1, keepdims=True)
        p = jnp.exp(sel_logits - m)
        p = p / jnp.sum(p, axis=-1, keepdims=True)               # [tm, E] f32

        # Gated combine of per-expert, classifier-folded logits + fused bias:
        #   logits = sum_e p_e * (A h W_e W_cls) + b  ==  h_new @ W_cls + b
        base = moe_hidden
        logits = bcls_ref[...] + p[:, 0:1] * agg[:, base:base + num_classes]
        for e in range(1, num_experts):
            lo = base + e * num_classes
            logits = logits + p[:, e:e + 1] * agg[:, lo:lo + num_classes]

        # Pack [logits | gates | topk(as f32) | zeros] -> single lane-dense store.
        used = num_classes + num_experts + top_k
        pad = out_ref.shape[1] - used
        out_ref[...] = jnp.concatenate(
            [logits, p, topk_f, jnp.zeros((logits.shape[0], pad), f32)], axis=-1)


# ----------------------------------------------------------------------------
# VMEM-budget-aware tiling
# ----------------------------------------------------------------------------
def _round_up(x, m):
    return ((x + m - 1) // m) * m


def _vmem_capacity_bytes():
    try:
        return int(pltpu.get_tpu_info().vmem_capacity_bytes)
    except Exception:
        return 64 << 20  # conservative: v7x per-TensorCore physical VMEM


def _choose_tiling(n, feat_w, cd_bytes, out_w):
    """Pick (row tile tm, padded rows, contraction tile tn, padded cols, vmem limit)."""
    cap = _vmem_capacity_bytes()
    # ~24 MiB per-step target on v7x (64 MiB physical), ~48 MiB on v5e/v6e.
    budget = min(cap * 3 // 8, 96 << 20)

    def footprint(tm, tn):
        adj = 2 * tm * tn * cd_bytes          # double-buffered adjacency tile
        hw = 2 * tn * feat_w * cd_bytes       # double-buffered fused-feature tile
        acc = tm * feat_w * 4                 # f32 accumulator scratch
        out = 2 * tm * out_w * 4              # double-buffered packed output tile
        return adj + hw + acc + out + (256 << 10)   # + small weights / misc

    def finish(tm, tn):
        n_rows = _round_up(n, tm)
        if tn >= n:
            n_cols, tn_eff = n, n
        else:
            n_cols, tn_eff = _round_up(n, tn), tn
        est = footprint(tm, tn_eff)
        vmem_limit = int(min(cap * 3 // 4, max(32 << 20, 2 * est)))
        return tm, n_rows, tn_eff, n_cols, vmem_limit

    candidates = [512, 256, 128, 64, 32, 16, 8]
    # Prefer >= 4 row tiles so both v7x TensorCores get >= 2 tiles each.
    tms = [c for c in candidates if pl.cdiv(n, c) >= 4] or [8]
    for tm in tms:
        if footprint(tm, n) <= budget:        # single contraction pass fits
            return finish(tm, n)
        for tn in (4096, 2048, 1024, 512, 256, 128):   # k-tile, (8,128)-legal
            if tn < n and footprint(tm, tn) <= budget:
                return finish(tm, tn)
    return finish(8, 128 if n > 128 else n)   # last resort: smallest tiles


# ----------------------------------------------------------------------------
# JAX glue: dense adjacency (data-dependent scatter) + parameter synthesis
# ----------------------------------------------------------------------------
def build_dense_adjacency(edge_index, edge_weight, num_nodes):
    # TODO(synk): data-dependent sparse scatter has no clean Pallas form; for
    # realistic graph sizes replace the dense O(N^2) adjacency with a
    # gather/segment-sum aggregation (and build it once, not per forward).
    src, dst = edge_index[0], edge_index[1]
    adj = jnp.zeros((num_nodes, num_nodes), jnp.float32).at[dst, src].add(edge_weight)
    return adj + jnp.eye(num_nodes, dtype=jnp.float32)


def init_params(key, in_dim, moe_hidden, expert_hidden, num_experts, num_classes):
    keys = jax.random.split(key, 4)
    scale = 0.1
    return {
        "w_moe":  jax.random.normal(keys[0], (in_dim, moe_hidden), jnp.float32) * scale,
        "w_gate": jax.random.normal(keys[1], (moe_hidden, num_experts), jnp.float32) * scale,
        # Experts pre-batched into a single [D, E*H] weight (column block e = W_e).
        "w_experts": jax.random.normal(
            keys[2], (in_dim, num_experts * expert_hidden), jnp.float32) * scale,
        "w_cls":  jax.random.normal(keys[3], (expert_hidden, num_classes), jnp.float32) * scale,
        "b_cls":  jnp.zeros((num_classes,), jnp.float32),
    }


# ----------------------------------------------------------------------------
# PurifiedGMoE.forward
# ----------------------------------------------------------------------------
def purified_gmoe_forward(params, h, edge_index, edge_weight, *, top_k,
                          compute_dtype=jnp.bfloat16):
    """Returns (logits [N,C], routing_info=[(sparse_gates [N,E], topk_idx [N,k])])."""
    N, D = h.shape
    Hm = params["w_moe"].shape[1]
    E = params["w_gate"].shape[1]
    EH = params["w_experts"].shape[1]
    H = EH // E
    C = params["w_cls"].shape[1]
    assert top_k <= E

    cd = compute_dtype
    cd_bytes = jnp.dtype(cd).itemsize

    adj = build_dense_adjacency(edge_index, edge_weight, N)

    # --- offline weight folding (exact; experts & classifier are linear) ------
    #   HW = [ h @ W_moe | h @ (W_1 @ W_cls) | ... | h @ (W_E @ W_cls) ]
    w_ec = jnp.einsum("deh,hc->dec",
                      params["w_experts"].reshape(D, E, H),
                      params["w_cls"]).reshape(D, E * C)
    hw = jnp.concatenate([h @ params["w_moe"], h @ w_ec], axis=-1)   # [N, F] f32
    feat = Hm + E * C
    feat_pad = _round_up(feat, 128)      # lane-dense MXU output / accumulator
    out_w = 128                          # packed output width (lane-dense store)
    assert C + E + top_k <= out_w

    tm, n_rows, tn, n_cols, vmem_limit = _choose_tiling(N, feat_pad, cd_bytes, out_w)
    grid = (n_rows // tm, n_cols // tn)

    # Zero-pad rows/cols (exact: padded adjacency cols and HW rows are zero).
    adj_p = jnp.zeros((n_rows, n_cols), jnp.float32).at[:N, :N].set(adj).astype(cd)
    hw_p = jnp.zeros((n_cols, feat_pad), jnp.float32).at[:N, :feat].set(hw).astype(cd)

    kernel = functools.partial(_fused_gmoe_kernel, moe_hidden=Hm,
                               num_experts=E, num_classes=C, top_k=top_k)

    cost = pl.CostEstimate(
        flops=2 * n_rows * n_cols * feat_pad + 2 * n_rows * Hm * E,
        transcendentals=n_rows * E,
        bytes_accessed=(n_rows * n_cols + grid[0] * n_cols * feat_pad) * cd_bytes
                       + n_rows * out_w * 4,
    )

    packed = pl.pallas_call(
        kernel,
        out_shape=jax.ShapeDtypeStruct((n_rows, out_w), jnp.float32),
        grid_spec=pltpu.PrefetchScalarGridSpec(
            num_scalar_prefetch=0,
            grid=grid,
            in_specs=[
                pl.BlockSpec((tm, tn), lambda i, k: (i, k)),        # adjacency tile
                pl.BlockSpec((tn, feat_pad), lambda i, k: (k, 0)),  # fused features
                pl.BlockSpec((Hm, E), lambda i, k: (0, 0)),         # gate weight
                pl.BlockSpec((1, C), lambda i, k: (0, 0)),          # classifier bias
            ],
            out_specs=pl.BlockSpec((tm, out_w), lambda i, k: (i, 0)),
            scratch_shapes=[pltpu.VMEM((tm, feat_pad), jnp.float32)],
        ),
        compiler_params=pltpu.CompilerParams(
            dimension_semantics=("parallel", "arbitrary"),
            vmem_limit_bytes=vmem_limit),
        cost_estimate=cost,
    )(adj_p, hw_p, params["w_gate"].astype(cd),
      params["b_cls"].reshape(1, C).astype(jnp.float32))

    # Unpack the lane-dense output slab.
    logits = packed[:N, :C]
    sparse_gates = packed[:N, C:C + E]
    topk_indices = packed[:N, C + E:C + E + top_k].astype(jnp.int32)

    routing_info = [(sparse_gates, topk_indices)]
    return logits, routing_info


# ----------------------------------------------------------------------------
if __name__ == "__main__":
    N, D = 64, 32          # nodes, input feature dim
    MOE_HIDDEN = 32        # h_moe dim (router input)
    EXPERT_HIDDEN = 32     # expert output dim
    NUM_EXPERTS = 4
    TOP_K = 2
    NUM_CLASSES = 8

    key = jax.random.PRNGKey(0)
    k_h, k_w, k_p = jax.random.split(key, 3)

    h = jax.random.normal(k_h, (N, D), jnp.float32)

    # Deterministic ring graph (both directions).
    idx = jnp.arange(N, dtype=jnp.int32)
    src = jnp.concatenate([idx, (idx + 1) % N])
    dst = jnp.concatenate([(idx + 1) % N, idx])
    edge_index = jnp.stack([src, dst], axis=0)                 # [2, 2N]
    edge_weight = jax.random.uniform(k_w, (2 * N,), jnp.float32, 0.5, 1.0)

    params = init_params(k_p, D, MOE_HIDDEN, EXPERT_HIDDEN, NUM_EXPERTS, NUM_CLASSES)

    logits, routing_info = purified_gmoe_forward(
        params, h, edge_index, edge_weight, top_k=TOP_K)
    jax.block_until_ready(logits)
    sparse_gates, topk_indices = routing_info[0]
    jax.block_until_ready(sparse_gates)
    jax.block_until_ready(topk_indices)

    assert logits.shape == (N, NUM_CLASSES)
    assert sparse_gates.shape == (N, NUM_EXPERTS)
    assert topk_indices.shape == (N, TOP_K)
    # Sanity: gates of each node are a top-k softmax (sum to 1, exactly k nonzeros).
    assert bool(jnp.allclose(sparse_gates.sum(axis=-1), 1.0, atol=1e-3))
    assert bool(jnp.all((sparse_gates > 0).sum(axis=-1) == TOP_K))
    print("KERNEL_OK")
</pallas_src>

<mosaic_0001>
module attributes {stable_mosaic.version = 11 : i64} {
  func.func @_fused_gmoe_kernel(%arg0: i32, %arg1: i32, %arg2: memref<16x64xbf16, #tpu.memory_space<vmem>>, %arg3: memref<64x128xbf16, #tpu.memory_space<vmem>>, %arg4: memref<32x4xbf16, #tpu.memory_space<vmem>>, %arg5: memref<1x8xf32, #tpu.memory_space<vmem>>, %arg6: memref<16x128xf32, #tpu.memory_space<vmem>>, %arg7: memref<16x128xf32, #tpu.memory_space<vmem>>) attributes {dimension_semantics = [#tpu.dimension_semantics<parallel>, #tpu.dimension_semantics<arbitrary>], iteration_bounds = array<i64: 4, 1>, scalar_prefetch = 0 : i64, scratch_operands = 1 : i64, tpu.core_type = #tpu.core_type<tc>, window_params = [{transform_indices = @transform_0, window_bounds = array<i64: 16, 64>}, {transform_indices = @transform_1, window_bounds = array<i64: 64, 128>}, {pipeline_mode = #tpu.pipeline_mode<synchronous>, transform_indices = @transform_2, window_bounds = array<i64: 32, 4>}, {pipeline_mode = #tpu.pipeline_mode<synchronous>, transform_indices = @transform_3, window_bounds = array<i64: 1, 8>}, {transform_indices = @transform_4, window_bounds = array<i64: 16, 128>}]} {
    %c0_i32 = arith.constant 0 : i32
    %0 = arith.cmpi eq, %arg1, %c0_i32 : i32
    %1 = arith.extui %0 : i1 to i32
    %c0_i32_0 = arith.constant 0 : i32
    %2 = arith.cmpi ne, %1, %c0_i32_0 : i32
    scf.if %2 {
      %cst_10 = arith.constant 0.000000e+00 : f32
      %12 = vector.broadcast %cst_10 : f32 to vector<16x128xf32>
      %c0_11 = arith.constant 0 : index
      %c0_12 = arith.constant 0 : index
      %13 = vector.load %arg7[%c0_11, %c0_12] : memref<16x128xf32, #tpu.memory_space<vmem>>, vector<16x128xf32>
      tpu.vector_store %arg7[%c0_11, %c0_12], %12 {strides = array<i32>} : memref<16x128xf32, #tpu.memory_space<vmem>>, vector<16x128xf32>,
    } else {
    }
    %c0 = arith.constant 0 : index
    %c0_1 = arith.constant 0 : index
    %3 = vector.load %arg7[%c0, %c0_1] : memref<16x128xf32, #tpu.memory_space<vmem>>, vector<16x128xf32>
    %c0_2 = arith.constant 0 : index
    %c0_3 = arith.constant 0 : index
    %4 = vector.load %arg2[%c0_2, %c0_3] : memref<16x64xbf16, #tpu.memory_space<vmem>>, vector<16x64xbf16>
    %c0_4 = arith.constant 0 : index
    %c0_5 = arith.constant 0 : index
    %5 = vector.load %arg3[%c0_4, %c0_5] : memref<64x128xbf16, #tpu.memory_space<vmem>>, vector<64x128xbf16>
    %cst = arith.constant dense<0.000000e+00> : vector<16x128xf32>
    %6 = tpu.matmul %4, %5, %cst {dimension_numbers = #tpu.dot_dimension_numbers<[1], [0], [0], [1], [0, 0, 1, 1], [], []>} : vector<16x64xbf16>, vector<64x128xbf16>, vector<16x128xf32> -> vector<16x128xf32>
    %7 = arith.addf %3, %6 : vector<16x128xf32>
    %c0_6 = arith.constant 0 : index
    %c0_7 = arith.constant 0 : index
    %8 = vector.load %arg7[%c0_6, %c0_7] : memref<16x128xf32, #tpu.memory_space<vmem>>, vector<16x128xf32>
    tpu.vector_store %arg7[%c0_6, %c0_7], %7 {strides = array<i32>} : memref<16x128xf32, #tpu.memory_space<vmem>>, vector<16x128xf32>,
    %c0_i32_8 = arith.constant 0 : i32
    %9 = arith.cmpi eq, %arg1, %c0_i32_8 : i32
    %10 = arith.extui %9 : i1 to i32
    %c0_i32_9 = arith.constant 0 : i32
    %11 = arith.cmpi ne, %10, %c0_i32_9 : i32
    scf.if %11 {
      %c0_10 = arith.constant 0 : index
      %c0_11 = arith.constant 0 : index
      %12 = vector.load %arg7[%c0_10, %c0_11] : memref<16x128xf32, #tpu.memory_space<vmem>>, vector<16x128xf32>
      %13 = vector.extract_strided_slice %12 {offsets = [0, 0], sizes = [16, 32], strides = [1, 1]} : vector<16x128xf32> to vector<16x32xf32>
      %cst_12 = arith.constant 0.000000e+00 : f32
      %14 = vector.broadcast %cst_12 : f32 to vector<16x32xf32>
      %15 = arith.maximumf %13, %14 : vector<16x32xf32>
      %16 = arith.truncf %15 : vector<16x32xf32> to vector<16x32xbf16>
      %c0_13 = arith.constant 0 : index
      %c0_14 = arith.constant 0 : index
      %17 = vector.load %arg4[%c0_13, %c0_14] : memref<32x4xbf16, #tpu.memory_space<vmem>>, vector<32x4xbf16>
      %cst_15 = arith.constant dense<0.000000e+00> : vector<16x4xf32>
      %18 = tpu.matmul %16, %17, %cst_15 {dimension_numbers = #tpu.dot_dimension_numbers<[1], [0], [0], [1], [0, 0, 1, 1], [], []>} : vector<16x32xbf16>, vector<32x4xbf16>, vector<16x4xf32> -> vector<16x4xf32>
      %19 = tpu.iota {dimensions = array<i32: 1>} : vector<16x4xi32>
      %false = arith.constant false
      %20 = vector.broadcast %false : i1 to vector<16x4xi1>
      %cst_16 = arith.constant dense<0xFF800000> : vector<16xf32>
      %21 = vector.multi_reduction <maximumf>, %18, %cst_16 [1] : vector<16x4xf32> to vector<16xf32>
      %22 = vector.shape_cast %21 : vector<16xf32> to vector<16x1xf32>
      %23 = vector.broadcast %22 : vector<16x1xf32> to vector<16x4xf32>
      %24 = arith.cmpf oeq, %18, %23 : vector<16x4xf32>
      %c4_i32 = arith.constant 4 : i32
      %25 = vector.broadcast %c4_i32 : i32 to vector<16x4xi32>
      %26 = arith.select %24, %19, %25 : vector<16x4xi1>, vector<16x4xi32>
      %cst_17 = arith.constant dense<2147483647> : vector<16xi32>
      %27 = vector.multi_reduction <minsi>, %26, %cst_17 [1] : vector<16x4xi32> to vector<16xi32>
      %28 = vector.shape_cast %27 : vector<16xi32> to vector<16x1xi32>
      %29 = vector.broadcast %28 : vector<16x1xi32> to vector<16x4xi32>
      %30 = arith.cmpi eq, %19, %29 : vector<16x4xi32>
      %31 = arith.ori %20, %30 : vector<16x4xi1>
      %cst_18 = arith.constant -1.000000e+30 : f32
      %32 = vector.broadcast %cst_18 : f32 to vector<16x4xf32>
      %33 = arith.select %30, %32, %18 : vector<16x4xi1>, vector<16x4xf32>
      %cst_19 = arith.constant dense<0xFF800000> : vector<16xf32>
      %34 = vector.multi_reduction <maximumf>, %33, %cst_19 [1] : vector<16x4xf32> to vector<16xf32>
      %35 = vector.shape_cast %34 : vector<16xf32> to vector<16x1xf32>
      %36 = vector.broadcast %35 : vector<16x1xf32> to vector<16x4xf32>
      %37 = arith.cmpf oeq, %33, %36 : vector<16x4xf32>
      %c4_i32_20 = arith.constant 4 : i32
      %38 = vector.broadcast %c4_i32_20 : i32 to vector<16x4xi32>
      %39 = arith.select %37, %19, %38 : vector<16x4xi1>, vector<16x4xi32>
      %cst_21 = arith.constant dense<2147483647> : vector<16xi32>
      %40 = vector.multi_reduction <minsi>, %39, %cst_21 [1] : vector<16x4xi32> to vector<16xi32>
      %41 = vector.shape_cast %40 : vector<16xi32> to vector<16x1xi32>
      %42 = vector.broadcast %41 : vector<16x1xi32> to vector<16x4xi32>
      %43 = arith.cmpi eq, %19, %42 : vector<16x4xi32>
      %44 = arith.ori %31, %43 : vector<16x4xi1>
      %45 = tpu.concatenate %28, %41 in 1 : vector<16x1xi32>, vector<16x1xi32> -> vector<16x2xi32>
      %46 = arith.sitofp %45 : vector<16x2xi32> to vector<16x2xf32>
      %cst_22 = arith.constant -1.000000e+30 : f32
      %47 = vector.broadcast %cst_22 : f32 to vector<16x4xf32>
      %48 = arith.select %44, %18, %47 : vector<16x4xi1>, vector<16x4xf32>
      %cst_23 = arith.constant dense<0xFF800000> : vector<16xf32>
      %49 = vector.multi_reduction <maximumf>, %48, %cst_23 [1] : vector<16x4xf32> to vector<16xf32>
      %50 = vector.shape_cast %49 : vector<16xf32> to vector<16x1xf32>
      %51 = vector.broadcast %50 : vector<16x1xf32> to vector<16x4xf32>
      %52 = arith.subf %48, %51 : vector<16x4xf32>
      %53 = math.exp %52 : vector<16x4xf32>
      %cst_24 = arith.constant dense<0.000000e+00> : vector<16xf32>
      %54 = vector.multi_reduction <add>, %53, %cst_24 [1] : vector<16x4xf32> to vector<16xf32>
      %55 = vector.shape_cast %54 : vector<16xf32> to vector<16x1xf32>
      %56 = vector.broadcast %55 : vector<16x1xf32> to vector<16x4xf32>
      %57 = arith.divf %53, %56 : vector<16x4xf32>
      %c0_25 = arith.constant 0 : index
      %c0_26 = arith.constant 0 : index
      %58 = vector.load %arg5[%c0_25, %c0_26] : memref<1x8xf32, #tpu.memory_space<vmem>>, vector<1x8xf32>
      %59 = vector.extract_strided_slice %57 {offsets = [0, 0], sizes = [16, 1], strides = [1, 1]} : vector<16x4xf32> to vector<16x1xf32>
      %60 = vector.extract_strided_slice %12 {offsets = [0, 32], sizes = [16, 8], strides = [1, 1]} : vector<16x128xf32> to vector<16x8xf32>
      %61 = vector.broadcast %59 : vector<16x1xf32> to vector<16x8xf32>
      %62 = arith.mulf %61, %60 : vector<16x8xf32>
      %63 = vector.broadcast %58 : vector<1x8xf32> to vector<16x8xf32>
      %64 = arith.addf %63, %62 : vector<16x8xf32>
      %65 = vector.extract_strided_slice %57 {offsets = [0, 1], sizes = [16, 1], strides = [1, 1]} : vector<16x4xf32> to vector<16x1xf32>
      %66 = vector.extract_strided_slice %12 {offsets = [0, 40], sizes = [16, 8], strides = [1, 1]} : vector<16x128xf32> to vector<16x8xf32>
      %67 = vector.broadcast %65 : vector<16x1xf32> to vector<16x8xf32>
      %68 = arith.mulf %67, %66 : vector<16x8xf32>
      %69 = arith.addf %64, %68 : vector<16x8xf32>
      %70 = vector.extract_strided_slice %57 {offsets = [0, 2], sizes = [16, 1], strides = [1, 1]} : vector<16x4xf32> to vector<16x1xf32>
      %71 = vector.extract_strided_slice %12 {offsets = [0, 48], sizes = [16, 8], strides = [1, 1]} : vector<16x128xf32> to vector<16x8xf32>
      %72 = vector.broadcast %70 : vector<16x1xf32> to vector<16x8xf32>
      %73 = arith.mulf %72, %71 : vector<16x8xf32>
      %74 = arith.addf %69, %73 : vector<16x8xf32>
      %75 = vector.extract_strided_slice %57 {offsets = [0, 3], sizes = [16, 1], strides = [1, 1]} : vector<16x4xf32> to vector<16x1xf32>
      %76 = vector.extract_strided_slice %12 {offsets = [0, 56], sizes = [16, 8], strides = [1, 1]} : vector<16x128xf32> to vector<16x8xf32>
      %77 = vector.broadcast %75 : vector<16x1xf32> to vector<16x8xf32>
      %78 = arith.mulf %77, %76 : vector<16x8xf32>
      %79 = arith.addf %74, %78 : vector<16x8xf32>
      %cst_27 = arith.constant 0.000000e+00 : f32
      %80 = vector.broadcast %cst_27 : f32 to vector<16x114xf32>
      %81 = tpu.concatenate %79, %57, %46, %80 in 1 : vector<16x8xf32>, vector<16x4xf32>, vector<16x2xf32>, vector<16x114xf32> -> vector<16x128xf32>
      %c0_28 = arith.constant 0 : index
      %c0_29 = arith.constant 0 : index
      %82 = vector.load %arg6[%c0_28, %c0_29] : memref<16x128xf32, #tpu.memory_space<vmem>>, vector<16x128xf32>
      tpu.vector_store %arg6[%c0_28, %c0_29], %81 {strides = array<i32>} : memref<16x128xf32, #tpu.memory_space<vmem>>, vector<16x128xf32>,
    } else {
    }
    return
  }
  func.func @transform_0(%arg0: i32, %arg1: i32) -> (i32, i32) {
    %c0_i32 = arith.constant 0 : i32
    return %arg0, %arg1 : i32, i32
  }
  func.func @transform_1(%arg0: i32, %arg1: i32) -> (i32, i32) {
    %c0_i32 = arith.constant 0 : i32
    %c0_i32_0 = arith.constant 0 : i32
    return %arg1, %c0_i32 : i32, i32
  }
  func.func @transform_2(%arg0: i32, %arg1: i32) -> (i32, i32) {
    %c0_i32 = arith.constant 0 : i32
    %c0_i32_0 = arith.constant 0 : i32
    %c0_i32_1 = arith.constant 0 : i32
    return %c0_i32, %c0_i32_0 : i32, i32
  }
  func.func @transform_3(%arg0: i32, %arg1: i32) -> (i32, i32) {
    %c0_i32 = arith.constant 0 : i32
    %c0_i32_0 = arith.constant 0 : i32
    %c0_i32_1 = arith.constant 0 : i32
    return %c0_i32, %c0_i32_0 : i32, i32
  }
  func.func @transform_4(%arg0: i32, %arg1: i32) -> (i32, i32) {
    %c0_i32 = arith.constant 0 : i32
    %c0_i32_0 = arith.constant 0 : i32
    return %arg0, %c0_i32 : i32, i32
  }
}

</mosaic_0001>

<bundles_post_ra>
// kernel: tpu_custom_call.1
= control target key start
LH: loop header
LB: loop body
LE: loop exit
PB: predicated region body
PF: predicated region fallthrough
CT: control target
= control target key end

     0   :  { %s1334_s0 = inlined_call_operand.hbm [shape: bf16[64,64], index: 0, kind: input, shape index: {}]   ;;  %s1335_s1 = inlined_call_operand.hbm [shape: bf16[64,128], index: 1, kind: input, shape index: {}]   ;;  %s1336_s2 = inlined_call_operand.vmem [shape: bf16[32,4], index: 2, kind: input, shape index: {}]   ;;  %s1337_s3 = inlined_call_operand.vmem [shape: f32[1,8], index: 3, kind: input, shape index: {}]   ;;  %s1338_s4 = inlined_call_operand.hbm [shape: f32[64,128], index: 4, kind: output, shape index: {}]  }
   0x1   :  { %1342 = sst [smem:[#allocation13_spill]] %s1335_s1 }
   0x2   :  { %9 = vsyncpa [#allocation4], 0 }
   0x3   :  { %11 = vsyncpa [#allocation4 + $0x1], 0 }
   0x4   :  { %12 = vsyncpa [#allocation7], 0 }
   0x5   :  { %13 = vsyncpa [#allocation5], 0 }
   0x6   :  { %15 = vsyncpa [#allocation5 + $0x1], 0  ;;  %s1088_s15 = smov 0   ;;  %s1090_s16 = smov 0  }
   0x7   :  { %s1092_s17 = smov 0   ;;  %s1094_s18 = smov 0  }
   0x8   :  { %s1096_s19 = smov 0   ;;  %s1098_s20 = smov 0  }
   0x9 LB: > { %s741_s21 = sadd.s32 4294967295, %s1047_s20   ;;  %s742_s22 = sadd.s32 4294967294, %s1047_s20   ;;  %s1047_s20 = sphi %s1098_s20, %s21_s20   ;;  %s1043_s19 = sphi %s1096_s19, %s1359_s19   ;;  %s1039_s18 = sphi %s1094_s18, %s1358_s18   ;;  %s1035_s17 = sphi %s1092_s17, %s1357_s17   ;;  %s1031_s16 = sphi %s1090_s16, %s1356_s16   ;;  %s1027_s15 = sphi %s1088_s15, %s1355_s15  }
   0xa   : > { %p55_p0 = scmp.ne.s32.totalorder %s1031_s16, %s1027_s15  ;;  %p1122_p1 = scmp.eq.s32.totalorder %s741_s21, 0 }
   0xb   : > { %p1126_p2 = scmp.eq.s32.totalorder %s741_s21, 3  ;;  %p153_p3 = scmp.eq.s32.totalorder %s742_s22, 3 }
   0xc   : > { %p1132_p4 = por %p1122_p1, %p55_p0  ;;  %p743_p5 = scmp.ge.s32.totalorder %s1047_s20, 1 }
   0xd   : > { %p1137_p6 = por %p153_p3, %p55_p0  ;;  %p160_p7 = scmp.lt.s32.totalorder %s1047_s20, 5 }
   0xe   : > { %s1347_s1 = sld [smem:[#allocation13_spill]]  ;;  %s1049_s5 = smov [#allocation6]  }
   0xf   : > { %p1145_p8 = pnand %p743_p5, %p160_p7  ;;  %s176_s6 = sshll.u32 %s1049_s5, 4  ;;  %s177_s6 = int_to_ptr.vmem [resolvable:$true] %s176_s6 }
  0x10   : > { %s1339_s7 = smov 64   ;;  %s1340_s8 = smov 4  }
  0x11   : > { %p805_p9 = pneg %p1145_p8  ;;  %s33_s9 = sadd.s32 1, %s1043_s19 }
  0x12   : > { %p35_p11 = scmp.ge.s32.totalorder %s33_s9, 4  ;;  %s42_s10 = sadd.s32 1, %s1035_s17 }
  0x13   : > { %p806_p10 = pnand %p805_p9, %p1122_p1  ;;  %p49_p12 = scmp.ne.s32.totalorder %s1035_s17, %s1031_s16 }
  0x14   : > { %s174_s29 = sshll.u32 %s1347_s1, 4  ;;  %p50_p13 = scmp.eq.s32.totalorder %s1047_s20, 0  ;;  %s175_s29 = int_to_ptr.hbm [resolvable:$true] %s174_s29 }
  0x15   : > { %808 = dma.hbm_to_vmem [thread:$0]  (!%p806_p10), %s175_s29, 512, %s177_s6, [#allocation7], %s1339_s7, %s1339_s7, %s1340_s8  }
  0x16   : > { %s1361_s9 = smov (%p35_p11, %s33_s9), 0  ;;  %p1163_p0 = por %p50_p13, %p49_p12 }
  0x17   : > { %1349 = sst [smem:[#allocation12_spill]] %s1361_s9  ;;  %p1169_p3 = por %p1126_p2, %p49_p12 }
  0x18   : > { %s37_s13 = ssub.s32 %s1043_s19, %s1361_s9  ;;  %p818_p5 = scmp.lt.s32.totalorder %s1047_s20, 4 }
  0x19   : > { %p40_p7 = scmp.eq.s32.totalorder %s37_s13, 0  ;;  %s196_s14 = sand.u32 1, %s1035_s17  }
  0x1a   : > { %s746_s21 = sshll.u32 %s196_s14, 3  ;;  %s788_s27 = sshll.u32 %s1043_s19, 3 }
  0x1b   : > { %s1178_s22 = scalar_select %p40_p7, %s1035_s17, %s42_s10  }
  0x1c   : > { %s206_s5 = scalar_lea.hbm %s1334_s0, %s788_s27  ;;  %s200_s6 = scalar_lea.vmem [#allocation3], %s746_s21 }
  0x1d   : > { %s209_s7 = sshll.u32 %s200_s6, 4  ;;  %s207_s24 = sshll.u32 %s206_s5, 4  ;;  %s210_s7 = int_to_ptr.vmem [resolvable:$true] %s209_s7  ;;  %s208_s24 = int_to_ptr.hbm [resolvable:$true] %s207_s24 }
  0x1e   : > { %p810_p2 = pnand %p818_p5, %p1163_p0  ;;  %s197_s8 = scalar_lea.sflag [#allocation4], %s196_s14 }
  0x1f   : > { %s1352_s1 = smov 4   ;;  %s1353_s9 = smov 64  }
  0x20   : > { %812 = dma.hbm_to_vmem [thread:$0]  (!%p810_p2), %s208_s24, 128, %s210_s7, %s197_s8, %s1353_s9, %s1353_s9, %s1352_s1  }
  0x21   : > { %221 = sbr.rel (%p1145_p8) target bundleno = 1587 (0x633), region = 36  ;;  %s1192_s10 = sand.u32 (!%p1145_p8), 1, %s1031_s16  }
  0x22   : > { %s750_s13 = sshll.u32 (!%p1145_p8), %s1192_s10, 3  ;;  %s224_s21 = scalar_lea.sflag (!%p1145_p8), [#allocation4], %s1192_s10 }
  0x23   : > { %s227_s27 = scalar_lea.vmem (!%p1145_p8), [#allocation3], %s750_s13 }
  0x26   : > { %1014 = dma.done.wait (%p1132_p4), %s224_s21, 128  }
  0x27   : > { %1016 = vsyncadd (%p1132_p4), %s224_s21, 4294967168 }
  0x28   : > { %1018 = dma.done.wait (%p1122_p1), [#allocation7], 512  }
  0x29   : > { %1020 = vsyncadd (%p1122_p1), [#allocation7], 4294966784  ;;  %v793_v0 = vld [vmem:[#allocation6 + $0x18] sm:$0xff]  ;;  %v792_v1 = vld [vmem:[#allocation6 + $0x10] sm:$0xff]  ;;  %vm309_vm0 = vcmask 523264   ;;  %vm355_vm1 = vcmask 261120   ;;  %v373_v16 = vlaneseq }
  0x2a   : > { %317 = vmatpush.bf16.msra.mxu0 %v793_v0  ;;  %v791_v2 = vld [vmem:[#allocation6 + $0x8] sm:$0xff]  ;;  %v790_v3 = vld [vmem:[#allocation6] sm:$0xff]  ;;  %v789_v4 = vld [vmem:[%s227_s27] sm:$0xff]  ;;  %vm375_vm2 = vcmask 31744   ;;  %s1056_s23 = smov 8   ;;  %s1057_s8 = smov 96  }
  0x2b   : > { %v795_v5 = vld [vmem:[%s1336_s2 + $0x8] sm:$0xff]  ;;  %v794_v6 = vld [vmem:[%s1336_s2] sm:$0xff]  ;;  %v1224_v17 = vand.u32 127, %v373_v16  ;;  %s1058_s9 = smov 88   ;;  %s1059_s11 = smov 80  }
  0x2c   : > { %365 = vmatpush.bf16.msra.mxu1 %v795_v5  ;;  %s1060_s14 = smov 12   ;;  %s1061_s28 = smov 72  }
  0x2d   : > { %s752_s6 = sshll.u32 %s1192_s10, 4  ;;  %s796_s24 = sshll.u32 %s1039_s18, 4 }
  0x2e   : > { %318 = vmatpush.bf16.msra.mxu0 %v792_v1  ;;  %s642_s27 = scalar_lea.hbm %s1338_s4, %s796_s24  ;;  %s257_s1 = scalar_lea.vmem [#allocation8], %s752_s6 }
  0x2f   : > { %s643_s25 = sshll.u32 %s257_s1, 4  ;;  %s645_s30 = sshll.u32 %s642_s27, 4  ;;  %s644_s25 = int_to_ptr.vmem [resolvable:$true] %s643_s25  ;;  %s646_s30 = int_to_ptr.hbm [resolvable:$true] %s645_s30 }
  0x30   : > { %366 = vmatpush.bf16.msra.mxu1 %v794_v6  ;;  %s631_s18 = scalar_lea.sflag [#allocation5], %s1192_s10  ;;  %s975_s7 = sshra.s32 %s646_s30, 4  ;;  %s976_s7 = int_to_ptr.hbm [resolvable:$true] %s975_s7 }
  0x31   : > { %p982_p9 = scmp.lt.s32.totalorder %s976_s7, %s1338_s4 }
  0x32   : > { %319 = vmatpush.bf16.msra.mxu0 %v791_v2 }
  0x36   : > { %320 = vmatpush.bf16.msra.mxu0 %v790_v3 }
  0x39   : > { %773 = vmatmul.msk.bf16.vlgmr.msra.gmra.mxu0 %vm309_vm0, %v789_v4 }
  0xb6   : > { %v1210_v7 = vpop.f32.mrf.mxu0 }
  0xb7   : > { %v336_v10 = vmax.f32 %v1210_v7, 0.0 }
  0xbe   : > { %v1212_v8 = vpop.f32.mrf.mxu0 }
  0xbf   : > { %v337_v9 = vmax.f32 %v1212_v8, 0.0 }
  0xc1   : > { %v338_v11 = vpack.c.bf16 %v337_v9, %v336_v10 }
  0xc3   : > { %782 = vmatmul.msk.bf16.vlgmr.msra.gmra.mxu1 %vm355_vm1, %v338_v11 }
 0x140   : > { %v1216_v12 = vpop.f32.mrf.mxu1 }
 0x141   : > { %v376_v13 = vsel %vm375_vm2, %v1216_v12, -inf }
 0x142   : > { %377 = vmax.xlane.f32.xlu0 %v376_v13 }
 0x148   : > { %v1220_v14 = vpop.f32.mrf.mxu1 }
 0x149   : > { %v379_v15 = vsel %vm375_vm2, %v1220_v14, -inf }
 0x14a   : > { %380 = vmax.xlane.f32.xlu0 %v379_v15 }
 0x1b5   : > { %v378_v18 = vpop.xlane.xlu0 %377 }
 0x1b6   : > { %vm382_vm3 = vcmp.eq.f32.partialorder %v1216_v12, %v378_v18 }
 0x1b7   : > { %v384_v19 = vsel %vm382_vm3, %v1224_v17, 4 }
 0x1b8   : > { %v386_v20 = vsel %vm375_vm2, %v384_v19, 2147483647 }
 0x1b9   : > { %v388_v21 = vshra.s32 %v386_v20, 16  ;;  %v387_v28 = vand.u32 65535, %v386_v20 }
 0x1bb   : > { %v390_v22 = vcvt.s32.f32 %v388_v21  ;;  %v389_v30 = vcvt.s32.f32 %v387_v28 }
 0x1bd   : > { %391 = vmin.xlane.f32.xlu1 %v390_v22  ;;  %v381_v23 = vpop.xlane.xlu0 %380 }
 0x1be   : > { %vm383_vm4 = vcmp.eq.f32.partialorder %v1220_v14, %v381_v23 }
 0x1bf   : > { %v385_v24 = vsel %vm383_vm4, %v1224_v17, 4 }
 0x1c0   : > { %v401_v25 = vsel %vm375_vm2, %v385_v24, 2147483647 }
 0x1c1   : > { %v403_v26 = vshra.s32 %v401_v25, 16  ;;  %v402_v32 = vand.u32 65535, %v401_v25 }
 0x1c3   : > { %v405_v27 = vcvt.s32.f32 %v403_v26  ;;  %v404_v34 = vcvt.s32.f32 %v402_v32 }
 0x1c5   : > { %406 = vmin.xlane.f32.xlu1 %v405_v27 }
 0x230   : > { %v392_v29 = vpop.xlane.xlu1 %391 }
 0x231   : > { %vm393_vm5 = vcmp.eq.f32.partialorder %v390_v22, %v392_v29  ;;  %v398_v36 = vcvt.f32.s32 %v392_v29 }
 0x232   : > { %v394_v31 = vsel %vm393_vm5, %v389_v30, inf }
 0x233   : > { %395 = vmin.xlane.f32.xlu2 %v394_v31  ;;  %v399_v38 = vshll.u32 %v398_v36, 16  ;;  %v1053_v31 = vmov 0  }
 0x234   : > { %883 = vset.pattern.permute.xlu1 %v1053_v31  ;;  %887 = vset.pattern.permute.xlu2 %v1053_v31 }
 0x238   : > { %v407_v33 = vpop.xlane.xlu1 %406 }
 0x239   : > { %vm408_vm6 = vcmp.eq.f32.partialorder %v405_v27, %v407_v33  ;;  %v413_v41 = vcvt.f32.s32 %v407_v33 }
 0x23a   : > { %v409_v35 = vsel %vm408_vm6, %v404_v34, inf }
 0x23b   : > { %410 = vmin.xlane.f32.xlu2 %v409_v35  ;;  %v414_v45 = vshll.u32 %v413_v41, 16 }
 0x2a6   : > { %v396_v37 = vpop.xlane.xlu2 %395 }
 0x2a7   : > { %v397_v39 = vcvt.f32.s32 %v396_v37 }
 0x2a9   : > { %v1232_v40 = vadd.s32 %v399_v38, %v397_v39 }
 0x2ab   : > { %vm416_vm7 = vcmp.eq.s32.totalorder %v1224_v17, %v1232_v40 }
 0x2ac   : > { %v418_v42 = vsel %vm416_vm7, -1e+30, %v1216_v12 }
 0x2ad   : > { %v420_v43 = vsel %vm375_vm2, %v418_v42, -inf }
 0x2ae   : > { %421 = vmax.xlane.f32.xlu0 %v420_v43  ;;  %v411_v44 = vpop.xlane.xlu2 %410 }
 0x2af   : > { %v412_v46 = vcvt.f32.s32 %v411_v44 }
 0x2b1   : > { %v1241_v47 = vadd.s32 %v414_v45, %v412_v46 }
 0x2b3   : > { %vm417_vm8 = vcmp.eq.s32.totalorder %v1224_v17, %v1241_v47 }
 0x2b4   : > { %v419_v48 = vsel %vm417_vm8, -1e+30, %v1220_v14 }
 0x2b5   : > { %v423_v49 = vsel %vm375_vm2, %v419_v48, -inf }
 0x2b6   : > { %424 = vmax.xlane.f32.xlu1 %v423_v49 }
 0x321   : > { %v422_v50 = vpop.xlane.xlu0 %421 }
 0x322   : > { %vm426_vm9 = vcmp.eq.f32.partialorder %v418_v42, %v422_v50 }
 0x323   : > { %v428_v51 = vsel %vm426_vm9, %v1224_v17, 4  ;;  %vm464_vm9 = vcmask 7168  }
 0x324   : > { %v430_v52 = vsel %vm375_vm2, %v428_v51, 2147483647 }
 0x325   : > { %v432_v53 = vshra.s32 %v430_v52, 16  ;;  %v431_v60 = vand.u32 65535, %v430_v52 }
 0x327   : > { %v434_v54 = vcvt.s32.f32 %v432_v53  ;;  %v433_v62 = vcvt.s32.f32 %v431_v60 }
 0x329   : > { %v425_v55 = vpop.xlane.xlu1 %424  ;;  %435 = vmin.xlane.f32.xlu2 %v434_v54 }
 0x32a   : > { %vm427_vm10 = vcmp.eq.f32.partialorder %v419_v48, %v425_v55 }
 0x32b   : > { %v429_v56 = vsel %vm427_vm10, %v1224_v17, 4  ;;  %vm619_vm10 = vcmask 64512  }
 0x32c   : > { %v445_v57 = vsel %vm375_vm2, %v429_v56, 2147483647 }
 0x32d   : > { %v447_v58 = vshra.s32 %v445_v57, 16  ;;  %v446_v0 = vand.u32 65535, %v445_v57 }
 0x32f   : > { %v449_v59 = vcvt.s32.f32 %v447_v58  ;;  %v448_v2 = vcvt.s32.f32 %v446_v0  ;;  %v1054_v58 = vmov 2  }
 0x331   : > { %450 = vmin.xlane.f32.xlu0 %v449_v59 }
 0x39c   : > { %v436_v61 = vpop.xlane.xlu2 %435 }
 0x39d   : > { %vm437_vm11 = vcmp.eq.f32.partialorder %v434_v54, %v436_v61  ;;  %v442_v4 = vcvt.f32.s32 %v436_v61 }
 0x39e   : > { %v438_v63 = vsel %vm437_vm11, %v433_v62, inf  ;;  %vm622_vm11 = vcmask 97280  }
 0x39f   : > { %439 = vmin.xlane.f32.xlu1 %v438_v63  ;;  %v443_v6 = vshll.u32 %v442_v4, 16 }
 0x3a4   : > { %v451_v1 = vpop.xlane.xlu0 %450 }
 0x3a5   : > { %vm452_vm12 = vcmp.eq.f32.partialorder %v449_v59, %v451_v1  ;;  %v457_v11 = vcvt.f32.s32 %v451_v1  ;;  %v1055_v59 = vmov 3  }
 0x3a6   : > { %v453_v3 = vsel %vm452_vm12, %v448_v2, inf  ;;  %vm625_vm12 = vcmask 113664  }
 0x3a7   : > { %454 = vmin.xlane.f32.xlu2 %v453_v3  ;;  %v458_v18 = vshll.u32 %v457_v11, 16 }
 0x412   : > { %v440_v5 = vpop.xlane.xlu1 %439 }
 0x413   : > { %v441_v9 = vcvt.f32.s32 %v440_v5 }
 0x415   : > { %v1254_v10 = vadd.s32 %v443_v6, %v441_v9 }
 0x417   : > { %vm460_vm13 = vcmp.eq.s32.totalorder %v1224_v17, %v1254_v10 }
 0x418   : > { %vm462_vm14 = vmor %vm416_vm7, %vm460_vm13 }
 0x419   : > { %v469_v13 = vsel %vm462_vm14, %v1216_v12, -1e+30 }
 0x41a   : > { %v455_v15 = vpop.xlane.xlu2 %454  ;;  %v471_v16 = vsel %vm375_vm2, %v469_v13, -inf }
 0x41b   : > { %v456_v19 = vcvt.f32.s32 %v455_v15  ;;  %472 = vmax.xlane.f32.xlu0 %v471_v16 }
 0x41d   : > { %v1263_v20 = vadd.s32 %v458_v18, %v456_v19 }
 0x41f   : > { %vm461_vm15 = vcmp.eq.s32.totalorder %v1224_v17, %v1263_v20  ;;  %v466_v6 = vsel %vm464_vm9, %v1241_v47, %v1263_v20  ;;  %v465_v47 = vsel %vm464_vm9, %v1232_v40, %v1254_v10 }
 0x420   : > { %vm463_vm0 = vmor %vm417_vm8, %vm461_vm15  ;;  %v468_v9 = vcvt.s32.f32 %v466_v6  ;;  %v467_v20 = vcvt.s32.f32 %v465_v47 }
 0x421   : > { %v470_v21 = vsel %vm463_vm0, %v1220_v14, -1e+30  ;;  %v1052_v14 = vmov 1  }
 0x422   : > { %v474_v22 = vsel %vm375_vm2, %v470_v21, -inf  ;;  %884 = vset.pattern.permute.xlu0 %v1052_v14 }
 0x423   : > { %475 = vmax.xlane.f32.xlu1 %v474_v22 }
 0x48e   : > { %v473_v12 = vpop.xlane.xlu0 %472 }
 0x48f   : > { %v477_v23 = vsub.f32 %v469_v13, %v473_v12 }
 0x491   : > { %v479_v24 = vmul.f32 1.442695, %v477_v23 }
 0x493   : > { %893 = vpow2.f32 %v479_v24 }
 0x496   : > { %v476_v25 = vpop.xlane.xlu1 %475 }
 0x497   : > { %v478_v26 = vsub.f32 %v470_v21, %v476_v25 }
 0x499   : > { %v894_v27 = vpop.eup %893  ;;  %v481_v28 = vmul.f32 1.442695, %v478_v26 }
 0x49a   : > { %v483_v29 = vsel %vm375_vm2, %v894_v27, 0.0 }
 0x49b   : > { %895 = vpow2.f32 %v481_v28  ;;  %484 = vadd.xlane.f32.xlu2 %v483_v29 }
 0x4a1   : > { %v896_v30 = vpop.eup %895 }
 0x4a2   : > { %v486_v17 = vsel %vm375_vm2, %v896_v30, 0.0 }
 0x4a3   : > { %487 = vadd.xlane.f32.xlu0 %v486_v17 }
 0x50e   : > { %v485_v32 = vpop.xlane.xlu2 %484 }
 0x50f   : > { %897 = vrcp.f32 %v485_v32  ;;  %v500_v37 = vand.u32 2147483648, %v485_v32  ;;  %v498_v39 = vand.u32 2147483647, %v485_v32  ;;  %vm494_vm3 = vweird.f32 %v485_v32 }
 0x511   : > { %v501_v43 = vor.u32 1.1754944e-38, %v500_v37  ;;  %vm499_vm4 = vcmp.eq.f32.partialorder %v498_v39, 8.507059e+37 }
 0x515   : > { %v898_v33 = vpop.eup %897 }
 0x516   : > { %v490_v34 = vmul.f32 %v898_v33, %v485_v32  ;;  %v488_v35 = vpop.xlane.xlu0 %487  ;;  %vm495_vm1 = vweird.f32 %v898_v33 }
 0x517   : > { %899 = vrcp.f32 %v488_v35  ;;  %vm496_vm2 = vmor %vm494_vm3, %vm495_vm1  ;;  %v515_v50 = vand.u32 2147483648, %v488_v35  ;;  %v513_v52 = vand.u32 2147483647, %v488_v35  ;;  %vm509_vm6 = vweird.f32 %v488_v35 }
 0x518   : > { %v491_v36 = vsub.f32 1.0, %v490_v34 }
 0x519   : > { %v516_v54 = vor.u32 1.1754944e-38, %v515_v50  ;;  %vm514_vm8 = vcmp.eq.f32.partialorder %v513_v52, 8.507059e+37 }
 0x51a   : > { %v492_v38 = vmul.f32 %v898_v33, %v491_v36 }
 0x51c   : > { %v493_v41 = vadd.f32 %v898_v33, %v492_v38 }
 0x51d   : > { %v900_v42 = vpop.eup %899 }
 0x51e   : > { %v497_v44 = vsel %vm496_vm2, %v898_v33, %v493_v41  ;;  %v505_v45 = vmul.f32 %v900_v42, %v488_v35  ;;  %vm510_vm5 = vweird.f32 %v900_v42 }
 0x51f   : > { %v502_v46 = vsel %vm499_vm4, %v501_v43, %v497_v44  ;;  %vm511_vm7 = vmor %vm509_vm6, %vm510_vm5 }
 0x520   : > { %v506_v48 = vsub.f32 1.0, %v505_v45  ;;  %v503_v49 = vmul.f32 %v894_v27, %v502_v46 }
 0x522   : > { %v507_v51 = vmul.f32 %v900_v42, %v506_v48  ;;  %546 = vperm.xlu0 %884, %v503_v49   ;;  %522 = vperm.xlu1 %883, %v503_v49  }
 0x524   : > { %v508_v53 = vadd.f32 %v900_v42, %v507_v51 }
 0x526   : > { %v512_v55 = vsel %vm511_vm7, %v900_v42, %v508_v53 }
 0x527   : > { %v517_v56 = vsel %vm514_vm8, %v516_v54, %v512_v55 }
 0x528   : > { %v518_v57 = vmul.f32 %v896_v30, %v517_v56 }
 0x52a   : > { %885 = vset.pattern.permute.xlu1 %v1054_v58  ;;  %527 = vperm.xlu2 %887, %v518_v57  }
 0x52b   : > { %566 = vperm.xlu1 %885, %v503_v49   ;;  %891 = vset.pattern.permute.xlu0 %v1055_v59 }
 0x532   : > { %888 = vset.pattern.permute.xlu2 %v1052_v14 }
 0x533   : > { %886 = vset.pattern.permute.xlu1 %v1055_v59  ;;  %550 = vperm.xlu2 %888, %v518_v57  }
 0x534   : > { %586 = vperm.xlu1 %886, %v503_v49  }
 0x53b   : > { %889 = vset.pattern.permute.xlu2 %v1054_v58 }
 0x53c   : > { %570 = vperm.xlu2 %889, %v518_v57  }
 0x544   : > { %890 = vset.pattern.permute.xlu2 %v1055_v59 }
 0x545   : > { %590 = vperm.xlu2 %890, %v518_v57  }
 0x54d   : > { %605 = vrot.lane.b32.xlu2 %v503_v49, %s1056_s23 }
 0x584   : > { %v528_v60 = vpop.permute.xlu2 %527 }
 0x585   : > { %v531_v11 = vmul.f32 %v528_v60, %v1212_v8 }
 0x58d   : > { %v551_v61 = vpop.permute.xlu2 %550 }
 0x58e   : > { %v554_v19 = vmul.f32 %v551_v61, %v1212_v8 }
 0x594   : > { %v523_v62 = vpop.permute.xlu1 %522  ;;  %v547_v63 = vpop.permute.xlu0 %546 }
 0x595   : > { %v530_v0 = vmul.f32 %v523_v62, %v1210_v7  ;;  %v553_v1 = vmul.f32 %v547_v63, %v1210_v7 }
 0x596   : > { %v571_v2 = vpop.permute.xlu2 %570 }
 0x597   : > { %537 = vrot.lane.b32.xlu1 %v530_v0, %s1057_s8  ;;  %557 = vrot.lane.b32.xlu2 %v553_v1, %s1058_s9  ;;  %v574_v3 = vmul.f32 %v571_v2, %v1212_v8 }
 0x59d   : > { %v567_v4 = vpop.permute.xlu1 %566 }
 0x59e   : > { %v573_v5 = vmul.f32 %v567_v4, %v1210_v7 }
 0x59f   : > { %579 = vrot.lane.b32.xlu2 %v574_v3, %s1059_s11  ;;  %v591_v16 = vpop.permute.xlu2 %590 }
 0x5a0   : > { %577 = vrot.lane.b32.xlu0 %v573_v5, %s1059_s11  ;;  %v594_v18 = vmul.f32 %v591_v16, %v1212_v8  ;;  %v892_v8 = vld [vmem:[%s1337_s3] ss:$0 sm:$0xff] }
 0x5a6   : > { %v587_v13 = vpop.permute.xlu1 %586 }
 0x5a7   : > { %v593_v15 = vmul.f32 %v587_v13, %v1210_v7  ;;  %615 = vrot.lane.b32.xlu2 %v468_v9, %s1060_s14  ;;  %v606_v7 = vpop.permute.xlu2 %605 }
 0x5a8   : > { %539 = vrot.lane.b32.xlu0 %v531_v11, %s1057_s8  ;;  %s977_s8 = scalar_lea.hbm %s976_s7, 16 }
 0x5a9   : > { %597 = vrot.lane.b32.xlu1 %v593_v15, %s1061_s28  ;;  %p978_p1 = scmp.ne.s32.totalorder %s976_s7, %s977_s8 }
 0x5ab   : > { %p979_p4 = pnand %p978_p1, %p1169_p3 }
 0x5ad   : > { %p980_p8 = pneg %p979_p4 }
 0x5b0   : > { %599 = vrot.lane.b32.xlu0 %v594_v18, %s1061_s28 }
 0x5b1   : > { %559 = vrot.lane.b32.xlu1 %v554_v19, %s1058_s9 }
 0x5b8   : > { %613 = vrot.lane.b32.xlu0 %v467_v20, %s1060_s14  ;;  %s981_s14 = scalar_lea.hbm %s1338_s4, 64 }
 0x5b9   : > { %607 = vrot.lane.b32.xlu1 %v518_v57, %s1056_s23  ;;  %p983_p10 = scmp.lt.s32.totalorder %s981_s14, %s977_s8 }
 0x5bb   : > { %p984_p11 = por %p983_p10, %p982_p9 }
 0x5bd   : > { %p985_p12 = pnand %p984_p11, %p980_p8 }
 0x5f1   : > { %v558_v12 = vpop.permute.xlu2 %557 }
 0x5f9   : > { %v580_v26 = vpop.permute.xlu2 %579 }
 0x601   : > { %v616_v36 = vpop.permute.xlu2 %615 }
 0x609   : > { %v538_v22 = vpop.permute.xlu1 %537 }
 0x60a   : > { %v543_v25 = vadd.f32 %v892_v8, %v538_v22 }
 0x60c   : > { %v563_v27 = vadd.f32 %v558_v12, %v543_v25 }
 0x612   : > { %v578_v21 = vpop.permute.xlu0 %577 }
 0x613   : > { %v583_v29 = vadd.f32 %v578_v21, %v563_v27 }
 0x61a   : > { %v540_v23 = vpop.permute.xlu0 %539 }
 0x61b   : > { %v598_v24 = vpop.permute.xlu1 %597  ;;  %v544_v40 = vadd.f32 %v892_v8, %v540_v23 }
 0x61c   : > { %v603_v17 = vadd.f32 %v598_v24, %v583_v29 }
 0x61e   : > { %v620_v32 = vsel %vm619_vm10, %v603_v17, %v606_v7 }
 0x622   : > { %v600_v10 = vpop.permute.xlu0 %599 }
 0x623   : > { %v560_v28 = vpop.permute.xlu1 %559 }
 0x624   : > { %v564_v30 = vadd.f32 %v560_v28, %v544_v40 }
 0x626   : > { %v584_v14 = vadd.f32 %v580_v26, %v564_v30 }
 0x628   : > { %v604_v31 = vadd.f32 %v600_v10, %v584_v14 }
 0x62a   : > { %v614_v33 = vpop.permute.xlu0 %613 }
 0x62b   : > { %v623_v34 = vsel %vm622_vm11, %v620_v32, %v614_v33  ;;  %v608_v35 = vpop.permute.xlu1 %607 }
 0x62c   : > { %v626_v37 = vsel %vm625_vm12, %v623_v34, 0.0  ;;  %v621_v38 = vsel %vm619_vm10, %v604_v31, %v608_v35 }
 0x62d   : > { %628 = vst [vmem:[%s257_s1] sm:$0xff] %v626_v37  ;;  %v624_v39 = vsel %vm622_vm11, %v621_v38, %v616_v36 }
 0x62e   : > { %v627_v41 = vsel %vm625_vm12, %v624_v39, 0.0 }
 0x62f   : > { %629 = vst [vmem:[%s257_s1 + $0x8] sm:$0xff] %v627_v41 }
 0x630   : > { %988 = shalt.err (!%p985_p12)
}
 0x631   : > { %s1062_s10 = smov 128  }
 0x632   : > { %803 = dma.vmem_to_hbm [thread:$0]  (%p1169_p3), %s644_s25, 256, %s646_s30, %s631_s18, %s1062_s10, %s1062_s10, %s1056_s23  }
 0x633 PF: > { %p820_p13 = scmp.ge.s32.totalorder %s1047_s20, 2  ;;  %s660_s5 = sand.u32 1, %s1027_s15  }
 0x634   : > { %s661_s6 = scalar_lea.sflag [#allocation5], %s660_s5 }
 0x635   : > { %p814_p0 = pnand %p820_p13, %p1137_p6 }
 0x637   : > { %p815_p5 = pneg %p814_p0 }
 0x639   : > { %1022 = dma.done.wait (%p815_p5), %s661_s6, 256  }
 0x63a   : > { %1024 = vsyncadd (%p815_p5), %s661_s6, 4294967040  ;;  %s21_s20 = sadd.s32 1, %s1047_s20   ;;  %s1354_s12 = sld [smem:[#allocation12_spill]] }
 0x63b   : > { %p18_p7 = scmp.ge.s32.totalorder %s21_s20, 6   ;;  %s1355_s15 = smov %s1031_s16 }
 0x63c   : > { %s1356_s16 = smov %s1035_s17  ;;  %s1357_s17 = smov %s1178_s22 }
 0x63d   : > { %s1358_s18 = smov %s1043_s19  ;;  %20 = sbr.rel (!%p18_p7) target bundleno = 9 (0x9), region = 94 }
 0x640   : > { %s1359_s19 = smov %s1354_s12 }
 0x642   :  { %667 = vsyncpa [#allocation4], 1 }
 0x643   :  { %669 = vsyncpa [#allocation4 + $0x1], 1 }
 0x644   :  { %670 = vsyncpa [#allocation7], 1 }
 0x645   :  { %671 = vsyncpa [#allocation5], 1 }
 0x646   :  { %673 = vsyncpa [#allocation5 + $0x1], 1 }

</bundles_post_ra>
